<compile_context>
chip_gen: v6e
topology: v6e:2x2x1
jax: 0.10.0
libtpu: 0.0.40
codegen_flags: <defaults>
</compile_context>

<pallas_src>
from functools import partial

import jax
import jax.numpy as jnp
from jax.experimental import pallas as pl
from jax.experimental.pallas import tpu as pltpu

_LANES_MIN = 128
_SUBLANES = 8
_BLOCK_ELEMS = 262144  # 1 MiB of f32 per input stream per grid step


# ---------------------------------------------------------------------------
# Pallas kernels
# ---------------------------------------------------------------------------
def _lut3_analog_kernel(coef_ref, a_ref, b_ref, c_ref, o_ref):
    # coef (SMEM, f32[8]): [P, Q, R, S, T, U, V, W]
    p, q, r, s = coef_ref[0], coef_ref[1], coef_ref[2], coef_ref[3]
    t, u, v, w = coef_ref[4], coef_ref[5], coef_ref[6], coef_ref[7]

    a = a_ref[...]
    b = b_ref[...]
    c = c_ref[...]

    hi = (p * a + q) * b + (r * a + s)   # 0.5*(M_high - M_low)
    lo = (t * a + u) * b + (v * a + w)   # 0.5*(M_high + M_low)
    o_ref[...] = hi * c + lo             # Mux(c, M_low, M_high)


def _lut3_hard_kernel(w_ref, a_ref, b_ref, c_ref, o_ref):
    # w (SMEM, f32[8]): perturbed weights.  out = w[(a>0) + 2*(b>0) + 4*(c>0)]
    a = a_ref[...]
    b = b_ref[...]
    c = c_ref[...]
    a_pos = a > 0.0
    b_pos = b > 0.0

    l01 = jnp.where(a_pos, w_ref[1], w_ref[0])
    l23 = jnp.where(a_pos, w_ref[3], w_ref[2])
    l45 = jnp.where(a_pos, w_ref[5], w_ref[4])
    l67 = jnp.where(a_pos, w_ref[7], w_ref[6])
    low = jnp.where(b_pos, l23, l01)
    high = jnp.where(b_pos, l67, l45)
    o_ref[...] = jnp.where(c > 0.0, high, low)


# ---------------------------------------------------------------------------
# Scalar folding: collapse the analog mux tree into 8 trilinear coefficients
# ---------------------------------------------------------------------------
def _fold_coefficients(wp):
    """wp: perturbed weights f32[8] -> coefficients f32[8] = [P,Q,R,S,T,U,V,W]."""
    # Level 1:  Mux(a, w2k, w2k+1) = g_k*a + h_k
    g0, h0 = 0.5 * (wp[1] - wp[0]), 0.5 * (wp[0] + wp[1])
    g1, h1 = 0.5 * (wp[3] - wp[2]), 0.5 * (wp[2] + wp[3])
    g2, h2 = 0.5 * (wp[5] - wp[4]), 0.5 * (wp[4] + wp[5])
    g3, h3 = 0.5 * (wp[7] - wp[6]), 0.5 * (wp[6] + wp[7])
    # Level 2:  Mux(b, L_even, L_odd) = (A*a + B)*b + C*a + D
    A0, B0, C0, D0 = 0.5 * (g1 - g0), 0.5 * (h1 - h0), 0.5 * (g0 + g1), 0.5 * (h0 + h1)
    A1, B1, C1, D1 = 0.5 * (g3 - g2), 0.5 * (h3 - h2), 0.5 * (g2 + g3), 0.5 * (h2 + h3)
    # Level 3:  Mux(c, M_low, M_high)
    P, Q, R, S = 0.5 * (A1 - A0), 0.5 * (B1 - B0), 0.5 * (C1 - C0), 0.5 * (D1 - D0)
    T, U, V, W = 0.5 * (A1 + A0), 0.5 * (B1 + B0), 0.5 * (C1 + C0), 0.5 * (D1 + D0)
    return jnp.stack([P, Q, R, S, T, U, V, W]).astype(jnp.float32)


# ---------------------------------------------------------------------------
# Layout helpers
# ---------------------------------------------------------------------------
def _choose_layout(n):
    """Pick the widest lane count (multiple of 128) that tiles n with no padding."""
    for lanes in (2048, 1024, 512, 256, 128):
        if n % (_SUBLANES * lanes) == 0:
            return lanes, 0
    lanes = _LANES_MIN
    pad = (-n) % (_SUBLANES * lanes)
    return lanes, pad


def _flatten(x, lanes, pad):
    flat = x.reshape(-1)
    if pad:  # only emits an HBM copy for unaligned element counts
        flat = jnp.pad(flat, (0, pad))
    return flat.reshape(-1, lanes)


# ---------------------------------------------------------------------------
# Wrapper
# ---------------------------------------------------------------------------
@partial(jax.jit, static_argnames=("hard",))
def lut3_pallas(a, b, c, w_perturbed, hard=False):
    orig_shape = a.shape
    n = a.size
    lanes, pad = _choose_layout(n)

    af = _flatten(a.astype(jnp.float32), lanes, pad)
    bf = _flatten(b.astype(jnp.float32), lanes, pad)
    cf = _flatten(c.astype(jnp.float32), lanes, pad)
    rows = af.shape[0]

    # ~1 MiB f32 per stream per block; rows is always a multiple of 8.
    tm = max(_SUBLANES, (_BLOCK_ELEMS // lanes) // _SUBLANES * _SUBLANES)
    tm = min(tm, rows)
    grid = (pl.cdiv(rows, tm),)
    vspec = pl.BlockSpec((tm, lanes), lambda i: (i, 0))

    if hard:
        kernel = _lut3_hard_kernel
        scalars = w_perturbed.astype(jnp.float32)
    else:
        kernel = _lut3_analog_kernel
        scalars = _fold_coefficients(w_perturbed.astype(jnp.float32))

    out = pl.pallas_call(
        kernel,
        grid=grid,
        out_shape=jax.ShapeDtypeStruct((rows, lanes), jnp.float32),
        in_specs=[
            pl.BlockSpec(memory_space=pltpu.MemorySpace.SMEM),  # 8 scalars
            vspec,
            vspec,
            vspec,
        ],
        out_specs=vspec,
        compiler_params=pltpu.CompilerParams(
            dimension_semantics=("parallel",)  # v7x: split rows across 2 TCs
        ),
    )(scalars, af, bf, cf)

    if pad:
        return out.reshape(-1)[:n].reshape(orig_shape)
    return out.reshape(orig_shape)


# ---------------------------------------------------------------------------
# prng() glue: deterministic 4-bit maximal-length sequence (scipy max_len_seq)
# ---------------------------------------------------------------------------
class _MLS4:
    """4-bit LFSR, taps=[3], initial state all ones (scipy.signal.max_len_seq)."""

    def __init__(self):
        self.state = [1, 1, 1, 1]
        self.taps = [3]

    def next_bit(self):
        out = self.state[0]
        feedback = self.state[0]
        for t in self.taps:
            feedback ^= self.state[t]
        self.state = self.state[1:] + [feedback]
        return out


def perturbed_weights(weights, noise):
    """Replicates w_i + |1 - |w_i|| * prng() * noise, prng drawn in order i=0..7."""
    lfsr = _MLS4()

    def prng():
        return 2.0 * lfsr.next_bit() - 1.0

    out = []
    for i in range(8):
        w = weights[i]
        out.append(w + jnp.abs(1.0 - jnp.abs(w)) * prng() * noise)
    return jnp.stack(out).astype(jnp.float32)


# ---------------------------------------------------------------------------
# Pure-JAX references (unfused, for correctness checks)
# ---------------------------------------------------------------------------
def _mux(s, a, b):
    return 0.5 * (s * b - s * a + a + b)


def lut3_ref_analog(a, b, c, wp):
    low = _mux(b, _mux(a, wp[0], wp[1]), _mux(a, wp[2], wp[3]))
    high = _mux(b, _mux(a, wp[4], wp[5]), _mux(a, wp[6], wp[7]))
    return _mux(c, low, high)


def lut3_ref_hard(a, b, c, wp):
    idx = (
        (a > 0).astype(jnp.int32)
        + 2 * (b > 0).astype(jnp.int32)
        + 4 * (c > 0).astype(jnp.int32)
    )
    return jnp.take(wp, idx)


# ---------------------------------------------------------------------------
if __name__ == "__main__":
    key = jax.random.PRNGKey(0)
    ka, kb, kc, kw = jax.random.split(key, 4)

    # NCHW inputs, small shapes.
    shape = (2, 4, 16, 16)
    a = jax.random.normal(ka, shape, dtype=jnp.float32)
    b = jax.random.normal(kb, shape, dtype=jnp.float32)
    c = jax.random.normal(kc, shape, dtype=jnp.float32)

    # Module initializes the 8 weights to zero; use deterministic nonzero
    # values here to exercise the math.
    weights = jax.random.uniform(kw, (8,), minval=-1.0, maxval=1.0, dtype=jnp.float32)

    noise = 0.125
    wp = perturbed_weights(weights, noise)

    # Analog semantics (mode = False path of Mux; defined for tensor selectors).
    out_a = jax.block_until_ready(lut3_pallas(a, b, c, wp, hard=False))
    ref_a = lut3_ref_analog(a, b, c, wp)
    assert out_a.shape == shape and out_a.dtype == jnp.float32
    assert jnp.allclose(out_a, ref_a, atol=1e-5, rtol=1e-5), "analog mismatch"

    # Hard semantics (mode = True, extended elementwise: 3-input LUT on signs).
    out_h = jax.block_until_ready(lut3_pallas(a, b, c, wp, hard=True))
    ref_h = lut3_ref_hard(a, b, c, wp)
    assert out_h.shape == shape and out_h.dtype == jnp.float32
    assert jnp.allclose(out_h, ref_h, atol=1e-6, rtol=1e-6), "hard mismatch"

    print("KERNEL_OK")
</pallas_src>

<mosaic_0001>
module attributes {stable_mosaic.version = 11 : i64} {
  func.func @_lut3_analog_kernel(%arg0: i32, %arg1: memref<8xf32, #tpu.memory_space<smem>>, %arg2: memref<8x256xf32, #tpu.memory_space<vmem>>, %arg3: memref<8x256xf32, #tpu.memory_space<vmem>>, %arg4: memref<8x256xf32, #tpu.memory_space<vmem>>, %arg5: memref<8x256xf32, #tpu.memory_space<vmem>>) attributes {dimension_semantics = [#tpu.dimension_semantics<parallel>], iteration_bounds = array<i64: 1>, scalar_prefetch = 0 : i64, scratch_operands = 0 : i64, tpu.core_type = #tpu.core_type<tc>, window_params = [{transform_indices = @transform_0, window_bounds = array<i64: 8>}, {transform_indices = @transform_1, window_bounds = array<i64: 8, 256>}, {transform_indices = @transform_2, window_bounds = array<i64: 8, 256>}, {transform_indices = @transform_3, window_bounds = array<i64: 8, 256>}, {transform_indices = @transform_4, window_bounds = array<i64: 8, 256>}]} {
    %c0 = arith.constant 0 : index
    %0 = memref.load %arg1[%c0] : memref<8xf32, #tpu.memory_space<smem>>
    %c1 = arith.constant 1 : index
    %1 = memref.load %arg1[%c1] : memref<8xf32, #tpu.memory_space<smem>>
    %c2 = arith.constant 2 : index
    %2 = memref.load %arg1[%c2] : memref<8xf32, #tpu.memory_space<smem>>
    %c3 = arith.constant 3 : index
    %3 = memref.load %arg1[%c3] : memref<8xf32, #tpu.memory_space<smem>>
    %c4 = arith.constant 4 : index
    %4 = memref.load %arg1[%c4] : memref<8xf32, #tpu.memory_space<smem>>
    %c5 = arith.constant 5 : index
    %5 = memref.load %arg1[%c5] : memref<8xf32, #tpu.memory_space<smem>>
    %c6 = arith.constant 6 : index
    %6 = memref.load %arg1[%c6] : memref<8xf32, #tpu.memory_space<smem>>
    %c7 = arith.constant 7 : index
    %7 = memref.load %arg1[%c7] : memref<8xf32, #tpu.memory_space<smem>>
    %c0_0 = arith.constant 0 : index
    %c0_1 = arith.constant 0 : index
    %8 = vector.load %arg2[%c0_0, %c0_1] : memref<8x256xf32, #tpu.memory_space<vmem>>, vector<8x256xf32>
    %c0_2 = arith.constant 0 : index
    %c0_3 = arith.constant 0 : index
    %9 = vector.load %arg3[%c0_2, %c0_3] : memref<8x256xf32, #tpu.memory_space<vmem>>, vector<8x256xf32>
    %c0_4 = arith.constant 0 : index
    %c0_5 = arith.constant 0 : index
    %10 = vector.load %arg4[%c0_4, %c0_5] : memref<8x256xf32, #tpu.memory_space<vmem>>, vector<8x256xf32>
    %11 = vector.broadcast %0 : f32 to vector<8x256xf32>
    %12 = arith.mulf %11, %8 : vector<8x256xf32>
    %13 = vector.broadcast %1 : f32 to vector<8x256xf32>
    %14 = arith.addf %12, %13 : vector<8x256xf32>
    %15 = arith.mulf %14, %9 : vector<8x256xf32>
    %16 = vector.broadcast %2 : f32 to vector<8x256xf32>
    %17 = arith.mulf %16, %8 : vector<8x256xf32>
    %18 = vector.broadcast %3 : f32 to vector<8x256xf32>
    %19 = arith.addf %17, %18 : vector<8x256xf32>
    %20 = arith.addf %15, %19 : vector<8x256xf32>
    %21 = vector.broadcast %4 : f32 to vector<8x256xf32>
    %22 = arith.mulf %21, %8 : vector<8x256xf32>
    %23 = vector.broadcast %5 : f32 to vector<8x256xf32>
    %24 = arith.addf %22, %23 : vector<8x256xf32>
    %25 = arith.mulf %24, %9 : vector<8x256xf32>
    %26 = vector.broadcast %6 : f32 to vector<8x256xf32>
    %27 = arith.mulf %26, %8 : vector<8x256xf32>
    %28 = vector.broadcast %7 : f32 to vector<8x256xf32>
    %29 = arith.addf %27, %28 : vector<8x256xf32>
    %30 = arith.addf %25, %29 : vector<8x256xf32>
    %31 = arith.mulf %20, %10 : vector<8x256xf32>
    %32 = arith.addf %31, %30 : vector<8x256xf32>
    %c0_6 = arith.constant 0 : index
    %c0_7 = arith.constant 0 : index
    %33 = vector.load %arg5[%c0_6, %c0_7] : memref<8x256xf32, #tpu.memory_space<vmem>>, vector<8x256xf32>
    tpu.vector_store %arg5[%c0_6, %c0_7], %32 {strides = array<i32>} : memref<8x256xf32, #tpu.memory_space<vmem>>, vector<8x256xf32>,
    return
  }
  func.func @transform_0(%arg0: i32) -> i32 {
    %c0_i32 = arith.constant 0 : i32
    %c0_i32_0 = arith.constant 0 : i32
    return %c0_i32 : i32
  }
  func.func @transform_1(%arg0: i32) -> (i32, i32) {
    %c0_i32 = arith.constant 0 : i32
    %c0_i32_0 = arith.constant 0 : i32
    return %arg0, %c0_i32 : i32, i32
  }
  func.func @transform_2(%arg0: i32) -> (i32, i32) {
    %c0_i32 = arith.constant 0 : i32
    %c0_i32_0 = arith.constant 0 : i32
    return %arg0, %c0_i32 : i32, i32
  }
  func.func @transform_3(%arg0: i32) -> (i32, i32) {
    %c0_i32 = arith.constant 0 : i32
    %c0_i32_0 = arith.constant 0 : i32
    return %arg0, %c0_i32 : i32, i32
  }
  func.func @transform_4(%arg0: i32) -> (i32, i32) {
    %c0_i32 = arith.constant 0 : i32
    %c0_i32_0 = arith.constant 0 : i32
    return %arg0, %c0_i32 : i32, i32
  }
}

</mosaic_0001>

<bundles_post_ra>
// kernel: lut3_pallas.1
= control target key start
LH: loop header
LB: loop body
LE: loop exit
PB: predicated region body
PF: predicated region fallthrough
CT: control target
= control target key end

     0   :  { %9 = vsyncpa [#allocation3], 0  ;;  %s171_s0 = inlined_call_operand.vmem [shape: f32[8], index: 0, kind: input, shape index: {}]   ;;  %s172_s1 = inlined_call_operand.vmem [shape: f32[8,256], index: 1, kind: input, shape index: {}]   ;;  %s173_s2 = inlined_call_operand.vmem [shape: f32[8,256], index: 2, kind: input, shape index: {}]   ;;  %s174_s3 = inlined_call_operand.vmem [shape: f32[8,256], index: 3, kind: input, shape index: {}]   ;;  %s175_s4 = inlined_call_operand.vmem [shape: f32[8,256], index: 4, kind: output, shape index: {}]  }
   0x1   :  { %s16_s17 = sshll.u32 %s171_s0, 4  ;;  %s17_s17 = int_to_ptr.vmem [resolvable:$true] %s16_s17 }
   0x2   :  { %s95_s18 = scalar_lea.vmem %s17_s17, 16  ;;  %p100_p1 = scmp.lt.s32.totalorder %s17_s17, %s17_s17 }
   0x3   :  { %p96_p0 = scmp.ne.s32.totalorder %s17_s17, %s95_s18  ;;  %p101_p2 = scmp.lt.s32.totalorder %s95_s18, %s95_s18 }
   0x5   :  { %p102_p3 = por %p101_p2, %p100_p1 }
   0x7   :  { %p103_p4 = pnand %p102_p3, %p96_p0 }
   0x9   :  { %106 = shalt.err (!%p103_p4)
}
   0xa   :  { %s109_s19 = smov [#allocation2]  }
   0xb   :  { %19 = dma.vmem_to_smem %s17_s17, 16, %s109_s19, [#allocation3]  }
   0xc   :  { %107 = dma.done.wait [#allocation3], 16  }
   0xd   :  { %108 = vsyncadd [#allocation3], 4294967280 }
   0xe   :  { %29 = sfence }
   0xf   :  { %s30_s20 = sld [smem:[#allocation2]]  ;;  %v38_v0 = vld [vmem:[%s172_s1] sm:$0xff]  ;;  %v39_v1 = vld [vmem:[%s172_s1 + $0x8] sm:$0xff] }
  0x10   :  { %s87_s21 = sld [smem:[#allocation2 + $0x1]]  ;;  %v40_v6 = vld [vmem:[%s173_s2] sm:$0xff]  ;;  %v41_v11 = vld [vmem:[%s173_s2 + $0x8] sm:$0xff] }
  0x11   :  { %s88_s22 = sld [smem:[#allocation2 + $0x2]]  ;;  %v42_v19 = vld [vmem:[%s174_s3] sm:$0xff]  ;;  %v43_v28 = vld [vmem:[%s174_s3 + $0x8] sm:$0xff] }
  0x12   :  { %s89_s23 = sld [smem:[#allocation2 + $0x3]] }
  0x13   :  { %s90_s24 = sld [smem:[#allocation2 + $0x4]] }
  0x14   :  { %s144_s28 = sld [smem:[#allocation2 + $0x5]] }
  0x15   :  { %s146_s29 = sld [smem:[#allocation2 + $0x6]]  ;;  %v44_v2 = vstv %s30_s20 }
  0x16   :  { %s148_s30 = sld [smem:[#allocation2 + $0x7]]  ;;  %v45_v3 = vmul.f32 %v44_v2, %v38_v0  ;;  %v47_v4 = vstv %s87_s21  ;;  %v46_v5 = vmul.f32 %v44_v2, %v39_v1 }
  0x17   :  { %v52_v7 = vstv %s88_s22 }
  0x18   :  { %v48_v8 = vadd.f32 %v47_v4, %v45_v3  ;;  %v53_v9 = vmul.f32 %v52_v7, %v38_v0  ;;  %v55_v10 = vstv %s89_s23  ;;  %v49_v12 = vadd.f32 %v47_v4, %v46_v5 }
  0x19   :  { %v60_v13 = vstv %s90_s24  ;;  %v54_v14 = vmul.f32 %v52_v7, %v39_v1 }
  0x1a   :  { %v50_v15 = vmul.f32 %v48_v8, %v40_v6  ;;  %v56_v16 = vadd.f32 %v55_v10, %v53_v9  ;;  %v61_v17 = vmul.f32 %v60_v13, %v38_v0  ;;  %v63_v18 = vstv %s144_s28 }
  0x1b   :  { %v68_v20 = vstv %s146_s29  ;;  %v51_v21 = vmul.f32 %v49_v12, %v41_v11  ;;  %v57_v22 = vadd.f32 %v55_v10, %v54_v14  ;;  %v62_v23 = vmul.f32 %v60_v13, %v39_v1 }
  0x1c   :  { %v58_v24 = vadd.f32 %v56_v16, %v50_v15  ;;  %v64_v25 = vadd.f32 %v63_v18, %v61_v17  ;;  %v69_v26 = vmul.f32 %v68_v20, %v38_v0  ;;  %v71_v27 = vstv %s148_s30 }
  0x1d   :  { %v59_v29 = vadd.f32 %v57_v22, %v51_v21  ;;  %v65_v30 = vadd.f32 %v63_v18, %v62_v23  ;;  %v70_v31 = vmul.f32 %v68_v20, %v39_v1 }
  0x1e   :  { %v66_v32 = vmul.f32 %v64_v25, %v40_v6  ;;  %v72_v33 = vadd.f32 %v71_v27, %v69_v26  ;;  %v76_v34 = vmul.f32 %v58_v24, %v42_v19 }
  0x1f   :  { %v67_v35 = vmul.f32 %v65_v30, %v41_v11  ;;  %v73_v36 = vadd.f32 %v71_v27, %v70_v31  ;;  %v77_v37 = vmul.f32 %v59_v29, %v43_v28 }
  0x20   :  { %v74_v38 = vadd.f32 %v72_v33, %v66_v32 }
  0x21   :  { %v75_v39 = vadd.f32 %v73_v36, %v67_v35 }
  0x22   :  { %v78_v40 = vadd.f32 %v76_v34, %v74_v38 }
  0x23   :  { %v79_v41 = vadd.f32 %v77_v37, %v75_v39 }
  0x24   :  { %80 = vst [vmem:[%s175_s4] sm:$0xff] %v78_v40 }
  0x25   :  { %81 = vst [vmem:[%s175_s4 + $0x8] sm:$0xff] %v79_v41 }
  0x26   :  { %86 = vsyncpa [#allocation3], 1 }

</bundles_post_ra>
